<compile_context>
chip_gen: v5e
topology: v5e:2x2
jax: 0.10.0
libtpu: 0.0.40
codegen_flags: <defaults>
</compile_context>

<pallas_src>
import functools

import jax
import jax.numpy as jnp
from jax import lax
from jax.experimental import pallas as pl
from jax.experimental.pallas import tpu as pltpu


# --------------------------------------------------------------------------- #
# Kernel
# --------------------------------------------------------------------------- #
def _focal_cosine_kernel(pred_ref, tgt_ref, out_ref, acc_ref, *,
                         alpha, gamma, xent, n_rows, tile_n, blocks_per_part):
    p = pl.program_id(0)          # partition (TensorCore) index
    i = pl.program_id(1)          # batch-tile index within the partition

    @pl.when(i == 0)
    def _init():
        acc_ref[...] = jnp.zeros_like(acc_ref)

    pred = pred_ref[...].astype(jnp.float32)   # (tn, C) — f32 up-cast on-chip
    tgt = tgt_ref[...]                         # (tn, 1) int32
    tn, c = pred.shape

    # Validity mask: rows past the real batch (padded last tile, or a clamped
    # out-of-range tile in the padded partition tail) contribute zero.
    logical_block = p * blocks_per_part + i
    row = logical_block * tile_n + lax.broadcasted_iota(jnp.int32, (tn, 1), 0)
    valid = row < n_rows                                            # (tn, 1)

    # One-hot selection mask via a tiny (1, C) iota broadcast against (tn, 1)
    # labels (TPU requires >= 2-D iota; no (tn, C) int32 temporary).
    col = lax.broadcasted_iota(jnp.int32, (1, c), 1)
    is_tgt = col == tgt                                             # (tn, C)

    # Shared per-row statistics (one XLU reduction pass each).
    sumsq = jnp.sum(pred * pred, axis=-1, keepdims=True)            # (tn, 1)
    dot = jnp.sum(jnp.where(is_tgt, pred, 0.0),
                  axis=-1, keepdims=True)                           # pred[tgt]
    inv_norm = lax.rsqrt(sumsq + 1e-24)                             # EUP rsqrt

    # cosine_embedding_loss term: cos(pred, onehot) = pred[tgt] / ||pred||
    # (||onehot|| == 1, so no second magnitude is needed).
    cos = dot * inv_norm                                            # (tn, 1)

    # cross_entropy(F.normalize(pred), target) per row.  normalized is in
    # [-1, 1] by construction, so the max-subtraction in log-sum-exp is
    # unnecessary (exp is bounded by e).
    normalized = pred * inv_norm                                    # (tn, C)
    lse = jnp.log(jnp.sum(jnp.exp(normalized), axis=-1, keepdims=True))
    # normalized[target] == cos; clamp tiny negative rounding residue.
    cent = jnp.maximum(lse - cos, 0.0)                              # (tn, 1)

    # focal term: alpha * (1 - exp(-ce))**gamma * ce
    pt = jnp.exp(-cent)
    q = 1.0 - pt
    if float(gamma) == int(gamma) and int(gamma) >= 0:
        qg = jnp.ones_like(q)
        for _ in range(int(gamma)):                 # integer power fast path
            qg = qg * q
    else:
        qg = q ** gamma                             # non-integer fallback
    focal = alpha * qg * cent                                       # (tn, 1)

    # Keep the valid-mask selects: padded rows compute on stale VMEM and may
    # produce NaN/Inf, but jnp.where does not propagate the unselected branch.
    cos_part = jnp.sum(jnp.where(valid, 1.0 - cos, 0.0), keepdims=True)
    focal_part = jnp.sum(jnp.where(valid, focal, 0.0), keepdims=True)
    acc_ref[...] += cos_part + xent * focal_part

    @pl.when(i == pl.num_programs(1) - 1)
    def _finalize():
        out_ref[...] = acc_ref[...]          # per-partition partial sum


# --------------------------------------------------------------------------- #
# Tiling / VMEM configuration
# --------------------------------------------------------------------------- #
def _vmem_config():
    """(scoped vmem limit, target native-dtype tile bytes) per generation."""
    try:
        cap = int(getattr(pltpu.get_tpu_info(), "vmem_capacity_bytes",
                          64 * 1024 * 1024))
    except Exception:
        cap = 64 * 1024 * 1024
    if cap >= 100 * 1024 * 1024:        # v5e / v6e: 128 MiB physical VMEM
        return 64 * 1024 * 1024, 8 * 1024 * 1024
    # v7x: only 64 MiB physical VMEM per TensorCore — stay well under it.
    return 48 * 1024 * 1024, 4 * 1024 * 1024


def _choose_tile_n(n, c, itemsize, vmem_limit, target_native_bytes):
    """Batch tile sized against native-dtype HBM bytes, bounded by a VMEM
    budget of 2x double-buffered native input + ~3 live f32 (tn, C)
    temporaries + the 128-lane-padded int32 label block (double-buffered)."""
    pack = max(8, (32 // (itemsize * 8)) * 8)     # f32:8, bf16:16, 8-bit:32
    bytes_per_row_native = c * itemsize
    per_row_vmem = (2 * bytes_per_row_native       # double-buffered pred tile
                    + 3 * c * 4                    # live f32 temporaries
                    + 2 * 128 * 4)                 # padded (tn,1) int32 labels
    budget_rows = max(pack, int(vmem_limit * 0.85) // per_row_vmem)
    rows = target_native_bytes // bytes_per_row_native
    rows = min(rows, budget_rows, 16384)
    rows = max(pack, (rows // pack) * pack)
    if rows >= n:
        return n
    return rows


# --------------------------------------------------------------------------- #
# Wrappers
# --------------------------------------------------------------------------- #
def _focal_cosine_loss_xla(pred, target, alpha, gamma, xent):
    """Fused plain-XLA path for small class counts (C < 128), where the Pallas
    kernel would use only C/128 of every lane and mask every DMA."""
    pred = pred.astype(jnp.float32)
    n, c = pred.shape
    tgt = target.astype(jnp.int32)
    inv_norm = lax.rsqrt(jnp.sum(pred * pred, axis=-1, keepdims=True) + 1e-24)
    normalized = pred * inv_norm
    cos = jnp.take_along_axis(normalized, tgt[:, None], axis=-1)[:, 0]
    cosine_loss = jnp.mean(1.0 - cos)
    lse = jnp.log(jnp.sum(jnp.exp(normalized), axis=-1))
    cent = jnp.maximum(lse - cos, 0.0)
    pt = jnp.exp(-cent)
    focal = alpha * (1.0 - pt) ** gamma * cent
    return cosine_loss + xent * jnp.mean(focal)


def _focal_cosine_loss_pallas(pred, target, alpha, gamma, xent):
    n, c = pred.shape
    tgt2d = target.astype(jnp.int32).reshape(n, 1)

    vmem_limit, target_native = _vmem_config()
    tile_n = _choose_tile_n(n, c, pred.dtype.itemsize, vmem_limit, target_native)

    n_blocks = int(pl.cdiv(n, tile_n))
    num_parts = 2 if n_blocks >= 2 else 1      # shard tiles across v7x's 2 TCs
    blocks_per_part = int(pl.cdiv(n_blocks, num_parts))
    last_block = n_blocks - 1

    def in_map(p, i):
        # Clamp so the padded tail of a partition re-reads the last real block;
        # its rows are masked to zero inside the kernel.
        return (jnp.minimum(p * blocks_per_part + i, last_block), 0)

    kernel = functools.partial(
        _focal_cosine_kernel,
        alpha=float(alpha), gamma=float(gamma), xent=float(xent),
        n_rows=n, tile_n=tile_n, blocks_per_part=blocks_per_part,
    )

    partials = pl.pallas_call(
        kernel,
        out_shape=jax.ShapeDtypeStruct((num_parts, 1), jnp.float32),
        grid_spec=pltpu.PrefetchScalarGridSpec(
            num_scalar_prefetch=0,
            grid=(num_parts, blocks_per_part),
            in_specs=[
                pl.BlockSpec((tile_n, c), in_map),
                pl.BlockSpec((tile_n, 1), in_map),
            ],
            out_specs=pl.BlockSpec((1, 1), lambda p, i: (p, 0)),
            scratch_shapes=[pltpu.VMEM((1, 1), jnp.float32)],
        ),
        compiler_params=pltpu.CompilerParams(
            dimension_semantics=("parallel", "arbitrary"),
            vmem_limit_bytes=vmem_limit,
        ),
    )(pred, tgt2d)   # native dtype straight through; f32 up-cast on-chip
    return jnp.sum(partials) / n               # mean reduction


def focal_cosine_loss(pred, target, alpha=1.0, gamma=2.0, xent=1.0):
    """pred: (N, C) float (f32/bf16/f16), target: (N,) int. Scalar f32 loss.
    Defaults match this module's signature (alpha=1, gamma=2, xent=1, mean)."""
    _, c = pred.shape
    if c < 128:
        # Small class counts waste >=7/8 of lane throughput in the kernel.
        return _focal_cosine_loss_xla(pred, target, float(alpha),
                                      float(gamma), float(xent))
    return _focal_cosine_loss_pallas(pred, target, alpha, gamma, xent)


# --------------------------------------------------------------------------- #
# Smoke test
# --------------------------------------------------------------------------- #
if __name__ == "__main__":
    key = jax.random.PRNGKey(0)
    k1, k2 = jax.random.split(key)
    N, C = 16, 128   # small batch; C=128 keeps the lane dim full -> Pallas path
    pred = jax.random.normal(k1, (N, C), dtype=jnp.float32)
    target = jax.random.randint(k2, (N,), 0, C, dtype=jnp.int32)

    loss = _focal_cosine_loss_pallas(pred, target, alpha=1.0, gamma=2.0, xent=1.0)
    jax.block_until_ready(loss)

    ref = _focal_cosine_loss_xla(pred, target, 1.0, 2.0, 1.0)
    jax.block_until_ready(ref)
    assert jnp.allclose(loss, ref, rtol=2e-4, atol=2e-4), (loss, ref)

    print("KERNEL_OK")
</pallas_src>

<mosaic_0001>
module attributes {stable_mosaic.version = 11 : i64} {
  func.func @_focal_cosine_kernel(%arg0: i32, %arg1: i32, %arg2: memref<16x128xf32, #tpu.memory_space<vmem>>, %arg3: memref<16x1xi32, #tpu.memory_space<vmem>>, %arg4: memref<1x1xf32, #tpu.memory_space<vmem>>, %arg5: memref<1x1xf32, #tpu.memory_space<vmem>>) attributes {dimension_semantics = [#tpu.dimension_semantics<parallel>, #tpu.dimension_semantics<arbitrary>], iteration_bounds = array<i64: 1, 1>, scalar_prefetch = 0 : i64, scratch_operands = 1 : i64, tpu.core_type = #tpu.core_type<tc>, window_params = [{transform_indices = @transform_0, window_bounds = array<i64: 16, 128>}, {transform_indices = @transform_1, window_bounds = array<i64: 16, 1>}, {transform_indices = @transform_2, window_bounds = array<i64: 1, 1>}]} {
    %c0_i32 = arith.constant 0 : i32
    %0 = arith.cmpi eq, %arg1, %c0_i32 : i32
    %1 = arith.extui %0 : i1 to i32
    %c0_i32_0 = arith.constant 0 : i32
    %2 = arith.cmpi ne, %1, %c0_i32_0 : i32
    scf.if %2 {
      %cst_26 = arith.constant 0.000000e+00 : f32
      %73 = vector.broadcast %cst_26 : f32 to vector<1x1xf32>
      %c0_27 = arith.constant 0 : index
      %c0_28 = arith.constant 0 : index
      %74 = vector.load %arg5[%c0_27, %c0_28] : memref<1x1xf32, #tpu.memory_space<vmem>>, vector<1x1xf32>
      tpu.vector_store %arg5[%c0_27, %c0_28], %73 {strides = array<i32>} : memref<1x1xf32, #tpu.memory_space<vmem>>, vector<1x1xf32>,
    } else {
    }
    %c0 = arith.constant 0 : index
    %c0_1 = arith.constant 0 : index
    %3 = vector.load %arg2[%c0, %c0_1] : memref<16x128xf32, #tpu.memory_space<vmem>>, vector<16x128xf32>
    %c0_2 = arith.constant 0 : index
    %c0_3 = arith.constant 0 : index
    %4 = vector.load %arg3[%c0_2, %c0_3] : memref<16x1xi32, #tpu.memory_space<vmem>>, vector<16x1xi32>
    %c1_i32 = arith.constant 1 : i32
    %5 = arith.muli %arg0, %c1_i32 : i32
    %6 = arith.addi %5, %arg1 : i32
    %c16_i32 = arith.constant 16 : i32
    %7 = arith.muli %6, %c16_i32 : i32
    %8 = tpu.iota {dimensions = array<i32: 0>} : vector<16x1xi32>
    %9 = vector.broadcast %7 : i32 to vector<16x1xi32>
    %10 = arith.addi %9, %8 : vector<16x1xi32>
    %c16_i32_4 = arith.constant 16 : i32
    %11 = vector.broadcast %c16_i32_4 : i32 to vector<16x1xi32>
    %12 = arith.cmpi slt, %10, %11 : vector<16x1xi32>
    %13 = tpu.iota {dimensions = array<i32: 1>} : vector<1x128xi32>
    %14 = vector.broadcast %13 : vector<1x128xi32> to vector<16x128xi32>
    %15 = vector.broadcast %4 : vector<16x1xi32> to vector<16x128xi32>
    %16 = arith.cmpi eq, %14, %15 : vector<16x128xi32>
    %17 = arith.mulf %3, %3 : vector<16x128xf32>
    %cst = arith.constant dense<0.000000e+00> : vector<16xf32>
    %18 = vector.multi_reduction <add>, %17, %cst [1] : vector<16x128xf32> to vector<16xf32>
    %19 = vector.shape_cast %18 : vector<16xf32> to vector<16x1xf32>
    %cst_5 = arith.constant 0.000000e+00 : f32
    %20 = vector.broadcast %cst_5 : f32 to vector<16x128xf32>
    %21 = arith.select %16, %3, %20 : vector<16x128xi1>, vector<16x128xf32>
    %cst_6 = arith.constant dense<0.000000e+00> : vector<16xf32>
    %22 = vector.multi_reduction <add>, %21, %cst_6 [1] : vector<16x128xf32> to vector<16xf32>
    %23 = vector.shape_cast %22 : vector<16xf32> to vector<16x1xf32>
    %cst_7 = arith.constant 1.000000e-24 : f32
    %24 = vector.broadcast %cst_7 : f32 to vector<16x1xf32>
    %25 = arith.addf %19, %24 : vector<16x1xf32>
    %26 = math.rsqrt %25 : vector<16x1xf32>
    %27 = arith.mulf %23, %26 : vector<16x1xf32>
    %28 = vector.broadcast %26 : vector<16x1xf32> to vector<16x128xf32>
    %29 = arith.mulf %3, %28 : vector<16x128xf32>
    %30 = math.exp %29 : vector<16x128xf32>
    %cst_8 = arith.constant dense<0.000000e+00> : vector<16xf32>
    %31 = vector.multi_reduction <add>, %30, %cst_8 [1] : vector<16x128xf32> to vector<16xf32>
    %32 = vector.shape_cast %31 : vector<16xf32> to vector<16x1xf32>
    %33 = math.log %32 : vector<16x1xf32>
    %34 = arith.subf %33, %27 : vector<16x1xf32>
    %cst_9 = arith.constant 0.000000e+00 : f32
    %35 = vector.broadcast %cst_9 : f32 to vector<16x1xf32>
    %36 = arith.maximumf %34, %35 : vector<16x1xf32>
    %cst_10 = arith.constant 0.000000e+00 : f32
    %37 = vector.broadcast %cst_10 : f32 to vector<16x1xf32>
    %38 = arith.subf %37, %36 : vector<16x1xf32>
    %39 = math.exp %38 : vector<16x1xf32>
    %cst_11 = arith.constant 1.000000e+00 : f32
    %40 = vector.broadcast %cst_11 : f32 to vector<16x1xf32>
    %41 = arith.subf %40, %39 : vector<16x1xf32>
    %cst_12 = arith.constant 1.000000e+00 : f32
    %42 = vector.broadcast %cst_12 : f32 to vector<16x1xf32>
    %43 = arith.mulf %42, %41 : vector<16x1xf32>
    %44 = arith.mulf %43, %41 : vector<16x1xf32>
    %cst_13 = arith.constant 1.000000e+00 : f32
    %45 = vector.broadcast %cst_13 : f32 to vector<16x1xf32>
    %46 = arith.mulf %45, %44 : vector<16x1xf32>
    %47 = arith.mulf %46, %36 : vector<16x1xf32>
    %cst_14 = arith.constant 1.000000e+00 : f32
    %48 = vector.broadcast %cst_14 : f32 to vector<16x1xf32>
    %49 = arith.subf %48, %27 : vector<16x1xf32>
    %cst_15 = arith.constant 0.000000e+00 : f32
    %50 = vector.broadcast %cst_15 : f32 to vector<16x1xf32>
    %51 = arith.select %12, %49, %50 : vector<16x1xi1>, vector<16x1xf32>
    %52 = vector.shape_cast %51 : vector<16x1xf32> to vector<1x16x1xf32>
    %cst_16 = arith.constant dense<0.000000e+00> : vector<1xf32>
    %53 = vector.multi_reduction <add>, %52, %cst_16 [1, 2] : vector<1x16x1xf32> to vector<1xf32>
    %54 = vector.shape_cast %53 : vector<1xf32> to vector<1x1x1xf32>
    %55 = vector.extract %54[0, 0, 0] : f32 from vector<1x1x1xf32>
    %56 = vector.broadcast %55 : f32 to vector<1x1xf32>
    %cst_17 = arith.constant 0.000000e+00 : f32
    %57 = vector.broadcast %cst_17 : f32 to vector<16x1xf32>
    %58 = arith.select %12, %47, %57 : vector<16x1xi1>, vector<16x1xf32>
    %59 = vector.shape_cast %58 : vector<16x1xf32> to vector<1x16x1xf32>
    %cst_18 = arith.constant dense<0.000000e+00> : vector<1xf32>
    %60 = vector.multi_reduction <add>, %59, %cst_18 [1, 2] : vector<1x16x1xf32> to vector<1xf32>
    %61 = vector.shape_cast %60 : vector<1xf32> to vector<1x1x1xf32>
    %62 = vector.extract %61[0, 0, 0] : f32 from vector<1x1x1xf32>
    %63 = vector.broadcast %62 : f32 to vector<1x1xf32>
    %c0_19 = arith.constant 0 : index
    %c0_20 = arith.constant 0 : index
    %64 = vector.load %arg5[%c0_19, %c0_20] : memref<1x1xf32, #tpu.memory_space<vmem>>, vector<1x1xf32>
    %cst_21 = arith.constant 1.000000e+00 : f32
    %65 = vector.broadcast %cst_21 : f32 to vector<1x1xf32>
    %66 = arith.mulf %65, %63 : vector<1x1xf32>
    %67 = arith.addf %56, %66 : vector<1x1xf32>
    %68 = arith.addf %64, %67 : vector<1x1xf32>
    %c0_22 = arith.constant 0 : index
    %c0_23 = arith.constant 0 : index
    %69 = vector.load %arg5[%c0_22, %c0_23] : memref<1x1xf32, #tpu.memory_space<vmem>>, vector<1x1xf32>
    tpu.vector_store %arg5[%c0_22, %c0_23], %68 {strides = array<i32>} : memref<1x1xf32, #tpu.memory_space<vmem>>, vector<1x1xf32>,
    %c0_i32_24 = arith.constant 0 : i32
    %70 = arith.cmpi eq, %arg1, %c0_i32_24 : i32
    %71 = arith.extui %70 : i1 to i32
    %c0_i32_25 = arith.constant 0 : i32
    %72 = arith.cmpi ne, %71, %c0_i32_25 : i32
    scf.if %72 {
      %c0_26 = arith.constant 0 : index
      %c0_27 = arith.constant 0 : index
      %73 = vector.load %arg5[%c0_26, %c0_27] : memref<1x1xf32, #tpu.memory_space<vmem>>, vector<1x1xf32>
      %c0_28 = arith.constant 0 : index
      %c0_29 = arith.constant 0 : index
      %74 = vector.load %arg4[%c0_28, %c0_29] : memref<1x1xf32, #tpu.memory_space<vmem>>, vector<1x1xf32>
      tpu.vector_store %arg4[%c0_28, %c0_29], %73 {strides = array<i32>} : memref<1x1xf32, #tpu.memory_space<vmem>>, vector<1x1xf32>,
    } else {
    }
    return
  }
  func.func @transform_0(%arg0: i32, %arg1: i32) -> (i32, i32) {
    %c1_i32 = arith.constant 1 : i32
    %0 = arith.muli %arg0, %c1_i32 : i32
    %1 = arith.addi %0, %arg1 : i32
    %c0_i32 = arith.constant 0 : i32
    %2 = arith.minsi %1, %c0_i32 : i32
    %c0_i32_0 = arith.constant 0 : i32
    %c0_i32_1 = arith.constant 0 : i32
    return %2, %c0_i32_0 : i32, i32
  }
  func.func @transform_1(%arg0: i32, %arg1: i32) -> (i32, i32) {
    %c1_i32 = arith.constant 1 : i32
    %0 = arith.muli %arg0, %c1_i32 : i32
    %1 = arith.addi %0, %arg1 : i32
    %c0_i32 = arith.constant 0 : i32
    %2 = arith.minsi %1, %c0_i32 : i32
    %c0_i32_0 = arith.constant 0 : i32
    %c0_i32_1 = arith.constant 0 : i32
    return %2, %c0_i32_0 : i32, i32
  }
  func.func @transform_2(%arg0: i32, %arg1: i32) -> (i32, i32) {
    %c0_i32 = arith.constant 0 : i32
    %c0_i32_0 = arith.constant 0 : i32
    return %arg0, %c0_i32 : i32, i32
  }
}

</mosaic_0001>

<bundles_post_ra>
// kernel: tpu_custom_call.1
= control target key start
LH: loop header
LB: loop body
LE: loop exit
PB: predicated region body
PF: predicated region fallthrough
CT: control target
= control target key end

     0   :  { %v294_v2 = vmov 0   ;;  %s334_s0 = inlined_call_operand.vmem [shape: f32[16,128], index: 0, kind: input, shape index: {}]   ;;  %s335_s1 = inlined_call_operand.vmem [shape: s32[16,1], index: 1, kind: input, shape index: {}]   ;;  %s336_s2 = inlined_call_operand.hbm [shape: f32[1,1], index: 2, kind: output, shape index: {}]  }
   0x1   :  { %v84_v0 = vld [vmem:[%s335_s1] sm:$0xff]  ;;  %250 = vset.pattern.permute.xlu1 %v294_v2  ;;  %251 = vset.pattern.permute.xlu0 %v294_v2 }
   0x2   :  { %v82_v1 = vld [vmem:[%s334_s0] sm:$0xff] }
   0x3   :  { %v106_v3 = vmul.f32 %v82_v1, %v82_v1 }
   0x4   :  { %7 = vsyncpa [#allocation4], 0  ;;  %99 = vperm.xlu1 %250, %v84_v0   ;;  %v83_v4 = vld [vmem:[%s334_s0 + $0x8] sm:$0xff]  ;;  %v96_v7 = vlaneseq  ;;  %vm176_vm8 = vcmask 7168   ;;  %vm80_vm9 = vcmask 0   ;;  %s296_s17 = smov [#allocation3]  }
   0x5   :  { %108 = vadd.xlane.f32.xlu0 %v106_v3  ;;  %v85_v5 = vld [vmem:[%s335_s1 + $0x8] sm:$0xff]  ;;  %v107_v6 = vmul.f32 %v83_v4, %v83_v4  ;;  %s220_s18 = sshll.u32 %s296_s17, 4  ;;  %s222_s21 = sshll.u32 %s336_s2, 4  ;;  %s221_s18 = int_to_ptr.vmem [resolvable:$true] %s220_s18  ;;  %s223_s21 = int_to_ptr.hbm [resolvable:$true] %s222_s21 }
   0x6   :  { %v97_v8 = vand.u32 127, %v96_v7 }
   0xc   :  { %102 = vperm.xlu1 %250, %v85_v5  }
   0xd   :  { %110 = vadd.xlane.f32.xlu0 %v107_v6 }
  0x76   :  { %v100_v9 = vpop.permute.xlu1 %99 }
  0x77   :  { %vm104_vm0 = vcmp.eq.s32.totalorder %v97_v8, %v100_v9 }
  0x78   :  { %v109_v10 = vpop.xlane.xlu0 %108  ;;  %v112_v11 = vsel %vm104_vm0, %v82_v1, 0.0 }
  0x79   :  { %v118_v12 = vadd.f32 1e-24, %v109_v10  ;;  %114 = vadd.xlane.f32.xlu0 %v112_v11 }
  0x7b   :  { %252 = vrsqrt.f32 %v118_v12  ;;  %vm126_vm3 = vweird.f32 %v118_v12 }
  0x7e   :  { %v103_v13 = vpop.permute.xlu1 %102 }
  0x7f   :  { %vm105_vm1 = vcmp.eq.s32.totalorder %v97_v8, %v103_v13 }
  0x80   :  { %v111_v14 = vpop.xlane.xlu0 %110  ;;  %v113_v15 = vsel %vm105_vm1, %v83_v4, 0.0 }
  0x81   :  { %v253_v16 = vpop.eup %252  ;;  %v119_v17 = vadd.f32 1e-24, %v111_v14  ;;  %116 = vadd.xlane.f32.xlu1 %v113_v15  ;;  %v295_v14 = vmov 0.0  }
  0x82   :  { %v121_v18 = vmul.f32 %v253_v16, %v118_v12  ;;  %vm127_vm2 = vweird.f32 %v253_v16  ;;  %81 = vst.msk [vmem:[#allocation2] sm:$0x1] %vm80_vm9, %v295_v14 }
  0x83   :  { %254 = vrsqrt.f32 %v119_v17  ;;  %vm128_vm4 = vmor %vm126_vm3, %vm127_vm2  ;;  %vm136_vm6 = vweird.f32 %v119_v17 }
  0x84   :  { %v122_v19 = vmul.f32 %v253_v16, %v121_v18 }
  0x86   :  { %v123_v20 = vmul.f32 0.5, %v122_v19 }
  0x88   :  { %v124_v21 = vsub.f32 1.5, %v123_v20 }
  0x89   :  { %v255_v22 = vpop.eup %254 }
  0x8a   :  { %v131_v23 = vmul.f32 %v255_v22, %v119_v17  ;;  %v125_v24 = vmul.f32 %v253_v16, %v124_v21  ;;  %vm137_vm5 = vweird.f32 %v255_v22 }
  0x8b   :  { %vm138_vm7 = vmor %vm136_vm6, %vm137_vm5 }
  0x8c   :  { %v132_v25 = vmul.f32 %v255_v22, %v131_v23  ;;  %v129_v26 = vsel %vm128_vm4, %v253_v16, %v125_v24  ;;  %v205_v24 = vld [vmem:[#allocation2] sm:$0x1] }
  0x8d   :  { %v142_v27 = vmul.f32 %v129_v26, %v82_v1 }
  0x8e   :  { %v133_v28 = vmul.f32 0.5, %v132_v25 }
  0x8f   :  { %v144_v29 = vmul.f32 1.442695, %v142_v27 }
  0x90   :  { %v134_v30 = vsub.f32 1.5, %v133_v28 }
  0x91   :  { %256 = vpow2.f32 %v144_v29 }
  0x92   :  { %v135_v31 = vmul.f32 %v255_v22, %v134_v30 }
  0x94   :  { %v139_v32 = vsel %vm138_vm7, %v255_v22, %v135_v31 }
  0x95   :  { %v143_v33 = vmul.f32 %v139_v32, %v83_v4 }
  0x97   :  { %v257_v34 = vpop.eup %256  ;;  %v146_v35 = vmul.f32 1.442695, %v143_v33 }
  0x98   :  { %148 = vadd.xlane.f32.xlu2 %v257_v34 }
  0x99   :  { %258 = vpow2.f32 %v146_v35 }
  0x9f   :  { %v259_v36 = vpop.eup %258 }
  0xa0   :  { %150 = vadd.xlane.f32.xlu2 %v259_v36 }
  0xec   :  { %v115_v37 = vpop.xlane.xlu0 %114 }
  0xed   :  { %v140_v38 = vmul.f32 %v129_v26, %v115_v37 }
  0xef   :  { %v172_v40 = vsub.f32 1.0, %v140_v38 }
  0xf1   :  { %v177_v43 = vsel %vm176_vm8, %v172_v40, 0.0 }
  0xf4   :  { %v117_v39 = vpop.xlane.xlu1 %116 }
  0xf5   :  { %v141_v41 = vmul.f32 %v139_v32, %v117_v39 }
  0xf7   :  { %v173_v42 = vsub.f32 1.0, %v141_v41 }
  0xf9   :  { %v178_v44 = vsel %vm176_vm8, %v173_v42, 0.0 }
  0xfa   :  { %v179_v45 = vadd.f32 %v178_v44, %v177_v43 }
  0xfc   :  { %180 = vadd.xlane.f32.xlu2 %v179_v45 }
 0x10b   :  { %v149_v46 = vpop.xlane.xlu2 %148 }
 0x10c   :  { %260 = vlog2.f32 %v149_v46 }
 0x112   :  { %v261_v47 = vpop.eup %260 }
 0x113   :  { %v153_v48 = vmul.f32 0.6931472, %v261_v47  ;;  %v151_v49 = vpop.xlane.xlu2 %150 }
 0x114   :  { %262 = vlog2.f32 %v151_v49 }
 0x115   :  { %v156_v50 = vsub.f32 %v153_v48, %v140_v38 }
 0x117   :  { %v158_v51 = vmax.f32 %v156_v50, 0.0 }
 0x119   :  { %v160_v52 = vsub.f32 0.0, %v158_v51 }
 0x11a   :  { %v263_v53 = vpop.eup %262 }
 0x11b   :  { %v162_v54 = vmul.f32 1.442695, %v160_v52  ;;  %v155_v55 = vmul.f32 0.6931472, %v263_v53 }
 0x11d   :  { %264 = vpow2.f32 %v162_v54  ;;  %v157_v56 = vsub.f32 %v155_v55, %v141_v41 }
 0x11f   :  { %v159_v57 = vmax.f32 %v157_v56, 0.0 }
 0x121   :  { %v161_v58 = vsub.f32 0.0, %v159_v57 }
 0x123   :  { %v265_v59 = vpop.eup %264  ;;  %v164_v60 = vmul.f32 1.442695, %v161_v58 }
 0x124   :  { %v166_v61 = vsub.f32 1.0, %v265_v59 }
 0x125   :  { %266 = vpow2.f32 %v164_v60 }
 0x126   :  { %v168_v62 = vmul.f32 %v166_v61, %v166_v61 }
 0x128   :  { %v170_v2 = vmul.f32 %v168_v62, %v158_v51 }
 0x12a   :  { %v192_v4 = vsel %vm176_vm8, %v170_v2, 0.0 }
 0x12b   :  { %v267_v63 = vpop.eup %266 }
 0x12c   :  { %v167_v0 = vsub.f32 1.0, %v267_v63 }
 0x12e   :  { %v169_v1 = vmul.f32 %v167_v0, %v167_v0 }
 0x130   :  { %v171_v3 = vmul.f32 %v169_v1, %v159_v57 }
 0x132   :  { %v193_v5 = vsel %vm176_vm8, %v171_v3, 0.0 }
 0x133   :  { %v194_v6 = vadd.f32 %v193_v5, %v192_v4 }
 0x135   :  { %195 = vadd.xlane.f32.xlu0 %v194_v6 }
 0x16f   :  { %v181_v7 = vpop.xlane.xlu2 %180 }
 0x170   :  { %v182_v8 = vrot.slane %v181_v7, 4 }
 0x172   :  { %v183_v9 = vadd.f32 %v182_v8, %v181_v7 }
 0x174   :  { %v184_v10 = vrot.slane %v183_v9, 2 }
 0x176   :  { %v185_v11 = vadd.f32 %v184_v10, %v183_v9 }
 0x178   :  { %v186_v12 = vrot.slane %v185_v11, 1 }
 0x17a   :  { %v187_v13 = vadd.f32 %v186_v12, %v185_v11 }
 0x17c   :  { %243 = vpush %v187_v13 }
 0x1a8   :  { %v196_v15 = vpop.xlane.xlu0 %195 }
 0x1a9   :  { %v197_v16 = vrot.slane %v196_v15, 4 }
 0x1ab   :  { %v198_v17 = vadd.f32 %v197_v16, %v196_v15 }
 0x1ad   :  { %v199_v18 = vrot.slane %v198_v17, 2  ;;  %s244_s0 = spop %243 }
 0x1ae   :  { %v189_v22 = vstv %s244_s0 }
 0x1af   :  { %v200_v19 = vadd.f32 %v199_v18, %v198_v17 }
 0x1b1   :  { %v201_v20 = vrot.slane %v200_v19, 1 }
 0x1b3   :  { %v202_v21 = vadd.f32 %v201_v20, %v200_v19 }
 0x1b5   :  { %245 = vpush %v202_v21 }
 0x1e6   :  { %s246_s1 = spop %245 }
 0x1e7   :  { %v204_v23 = vstv %s246_s1 }
 0x1e8   :  { %v206_v25 = vadd.f32 %v204_v23, %v189_v22 }
 0x1ea   :  { %v207_v26 = vadd.f32 %v206_v25, %v205_v24 }
 0x1ec   :  { %209 = vst.msk [vmem:[#allocation2] sm:$0x1] %vm80_vm9, %v207_v26 }
 0x1f3   :  { %v213_v27 = vld [vmem:[#allocation2] sm:$0x1] }
 0x1f4   :  { %214 = vst.msk [vmem:[#allocation3] sm:$0x1] %vm80_vm9, %v213_v27 }
 0x1f5   :  { %225 = dma.vmem_to_hbm [thread:$0]  %s221_s18, 16, %s223_s21, [#allocation4]  }
 0x1f6   :  { %292 = dma.done.wait [#allocation4], 16  }
 0x1f7   :  { %293 = vsyncadd [#allocation4], 4294967280 }
 0x1f8   :  { %230 = vsyncpa [#allocation4], 1 }

</bundles_post_ra>
